<compile_context>
chip_gen: v5e
topology: v5e:2x2
jax: 0.10.0
libtpu: 0.0.40
codegen_flags: <defaults>
</compile_context>

<pallas_src>
import numpy as np
import jax
import jax.numpy as jnp
from jax.experimental import pallas as pl
from jax.experimental.pallas import tpu as pltpu

F32 = jnp.float32

# TODO(synk): the original module does np.load('.../graph_fc.npy'); we use an
# in-script deterministic stand-in with the same semantics (#families / clan).
FC = np.array([1, 3, 5, 2, 1, 4, 7, 2], dtype=np.int32)
NUM_CLANS = int(FC.shape[0])
D = 256
CPAD = 128          # clan-logit lanes, padded lane-dense (>= NUM_CLANS)
FPAD = 128          # family-logit lanes, padded lane-dense (>= max(FC))


# ------------------------------ kernel ------------------------------------- #

def _masked_ce_rows(logits, labels, num_valid):
    """Row-wise -log softmax(logits)[label]; lanes >= num_valid are masked out.

    logits: (B, K) f32, labels: (B, 1) int32, num_valid: int or (B, 1) int32.
    Returns (B, 1) f32.
    """
    neg = jnp.float32(-1e30)
    lanes = jax.lax.broadcasted_iota(jnp.int32, logits.shape, 1)
    valid = lanes < num_valid
    m = jnp.max(jnp.where(valid, logits, neg), axis=-1, keepdims=True)
    p = jnp.exp(jnp.where(valid, logits - m, neg))              # pad lanes -> 0
    lse = m + jnp.log(jnp.sum(p, axis=-1, keepdims=True))
    tgt = jnp.sum(jnp.where(lanes == labels, logits, 0.0), axis=-1, keepdims=True)
    return lse - tgt


def supervised_loss_kernel(x_ref, wcT_ref, bc_ref, wf_ref, bf_ref,
                           lc_ref, lf_ref, nf_ref, out_ref):
    B = x_ref.shape[0]
    x = jnp.mean(x_ref[...], axis=1)                            # (B, D) mean over seq
    lc = lc_ref[...]                                            # (B, 1) int32
    lf = lf_ref[...]                                            # (B, 1) int32
    nf = nf_ref[...]                                            # (B, 1) int32 = fc[clan]

    # clan head: (B, D) @ (D, CPAD), batch folded into M
    logits_c = jnp.dot(x, wcT_ref[...], preferred_element_type=F32) + bc_ref[...]
    ce_clan = _masked_ce_rows(logits_c, lc, NUM_CLANS)          # (B, 1)
    loss_clan = jnp.sum(ce_clan, axis=0, keepdims=True)         # (1, 1)

    # per-sample family head: batched (1, D) @ (D, FPAD) with gathered weights
    logits_f = jnp.einsum("bkd,bdf->bkf", x[:, None, :], wf_ref[...],
                          preferred_element_type=F32)           # (B, 1, FPAD)
    logits_f = logits_f.reshape(B, FPAD) + bf_ref[...]          # (B, FPAD)
    ce_fam = _masked_ce_rows(logits_f, lf, nf)                  # (B, 1)
    gate = (nf > 1).astype(F32)                                 # skip clans with 1 family
    loss_fam = jnp.sum(gate * ce_fam, axis=0, keepdims=True)    # (1, 1)
    count = jnp.sum(gate, axis=0, keepdims=True)                # (1, 1)

    out_ref[...] = (loss_clan + loss_fam) / (jnp.float32(B) + count)


# ------------------------------ wrapper ------------------------------------ #

def net_supervised_loss_forward(params, output, label_clan, label_family):
    B = output.shape[0]

    # glue: per-sample gather of the stacked / zero-padded family classifiers
    wf_sel = jnp.take(params["wfT_all"], label_clan, axis=0)     # (B, D, FPAD)
    bf_sel = jnp.take(params["bf_all"], label_clan, axis=0)      # (B, FPAD)
    nf = jnp.take(params["fc"], label_clan, axis=0).astype(jnp.int32).reshape(B, 1)
    lc = label_clan.astype(jnp.int32).reshape(B, 1)
    lf = label_family.astype(jnp.int32).reshape(B, 1)

    vmem = pl.BlockSpec(memory_space=pltpu.MemorySpace.VMEM)
    loss = pl.pallas_call(
        supervised_loss_kernel,
        out_shape=jax.ShapeDtypeStruct((1, 1), F32),
        in_specs=[vmem] * 8,
        out_specs=vmem,
    )(output.astype(F32), params["wcT"], params["bc"], wf_sel, bf_sel, lc, lf, nf)
    return loss[0, 0]


# ------------------------------ parameters --------------------------------- #

def init_params(key):
    ks = iter(jax.random.split(key, 2 + 2 * NUM_CLANS))
    bd = 1.0 / np.sqrt(D)

    def uni(k, shape):
        return jax.random.uniform(k, shape, F32, -bd, bd)

    wc = uni(next(ks), (NUM_CLANS, D))
    bc = uni(next(ks), (NUM_CLANS,))
    wcT = jnp.zeros((D, CPAD), F32).at[:, :NUM_CLANS].set(wc.T)
    bc_pad = jnp.zeros((1, CPAD), F32).at[0, :NUM_CLANS].set(bc)

    wf_list, bf_list = [], []
    wfT_all = jnp.zeros((NUM_CLANS, D, FPAD), F32)
    bf_all = jnp.zeros((NUM_CLANS, FPAD), F32)
    for c in range(NUM_CLANS):
        f = int(FC[c])
        w = uni(next(ks), (f, D))
        b = uni(next(ks), (f,))
        wf_list.append(w)
        bf_list.append(b)
        wfT_all = wfT_all.at[c, :, :f].set(w.T)
        bf_all = bf_all.at[c, :f].set(b)

    return {"wcT": wcT, "bc": bc_pad, "wfT_all": wfT_all, "bf_all": bf_all,
            "fc": jnp.asarray(FC, jnp.int32),
            # unpadded copies, used only by the pure-JAX/numpy reference check
            "wc": wc, "bc_raw": bc, "wf_list": wf_list, "bf_list": bf_list}


# ------------------------------ reference ---------------------------------- #

def reference_loss(params, output, label_clan, label_family):
    x = np.asarray(output, np.float32).mean(axis=1)              # (B, D)
    wc = np.asarray(params["wc"], np.float32)
    bc = np.asarray(params["bc_raw"], np.float32)
    lc = np.asarray(label_clan)
    lf = np.asarray(label_family)
    B = x.shape[0]

    logits = x @ wc.T + bc
    logits = logits - logits.max(axis=-1, keepdims=True)
    logp = logits - np.log(np.exp(logits).sum(axis=-1, keepdims=True))
    loss_clan = float(-logp[np.arange(B), lc].sum())

    loss_fam, count = 0.0, 0
    for n in range(B):
        c = int(lc[n])
        if FC[c] > 1:
            lg = x[n] @ np.asarray(params["wf_list"][c], np.float32).T \
                 + np.asarray(params["bf_list"][c], np.float32)
            lg = lg - lg.max()
            lp = lg - np.log(np.exp(lg).sum())
            loss_fam += float(-lp[int(lf[n])])
            count += 1
    return (loss_clan + loss_fam) / (B + count)


# ------------------------------ main ---------------------------------------- #

if __name__ == "__main__":
    key = jax.random.PRNGKey(0)
    kp, kx = jax.random.split(key)
    params = init_params(kp)

    B, L = 4, 8
    output = jax.random.normal(kx, (B, L, D), F32)
    # fc[label_clan] = [1, 5, 4, 3] -> sample 0 is skipped (fc == 1), count = 3
    label_clan = jnp.array([0, 2, 5, 1], jnp.int32)
    label_family = jnp.array([0, 3, 1, 2], jnp.int32)

    fwd = jax.jit(net_supervised_loss_forward)
    loss = fwd(params, output, label_clan, label_family)
    jax.block_until_ready(loss)

    ref = reference_loss(params, output, label_clan, label_family)
    lv = float(loss)
    assert np.isfinite(lv), lv
    assert abs(lv - ref) < 1e-3 * max(1.0, abs(ref)), (lv, ref)
    print("KERNEL_OK")
</pallas_src>

<mosaic_0001>
module attributes {stable_mosaic.version = 11 : i64} {
  func.func @supervised_loss_kernel(%arg0: memref<4x8x256xf32, #tpu.memory_space<vmem>>, %arg1: memref<256x128xf32, #tpu.memory_space<vmem>>, %arg2: memref<1x128xf32, #tpu.memory_space<vmem>>, %arg3: memref<4x256x128xf32, #tpu.memory_space<vmem>>, %arg4: memref<4x128xf32, #tpu.memory_space<vmem>>, %arg5: memref<4x1xi32, #tpu.memory_space<vmem>>, %arg6: memref<4x1xi32, #tpu.memory_space<vmem>>, %arg7: memref<4x1xi32, #tpu.memory_space<vmem>>, %arg8: memref<1x1xf32, #tpu.memory_space<vmem>>) attributes {dimension_semantics = [], scalar_prefetch = 0 : i64, scratch_operands = 0 : i64, tpu.core_type = #tpu.core_type<tc>} {
    %c0 = arith.constant 0 : index
    %c0_0 = arith.constant 0 : index
    %c0_1 = arith.constant 0 : index
    %0 = vector.load %arg0[%c0, %c0_0, %c0_1] : memref<4x8x256xf32, #tpu.memory_space<vmem>>, vector<4x8x256xf32>
    %cst = arith.constant dense<0.000000e+00> : vector<4x256xf32>
    %1 = vector.multi_reduction <add>, %0, %cst [1] : vector<4x8x256xf32> to vector<4x256xf32>
    %cst_2 = arith.constant 8.000000e+00 : f32
    %2 = vector.broadcast %cst_2 : f32 to vector<4x256xf32>
    %3 = arith.divf %1, %2 : vector<4x256xf32>
    %c0_3 = arith.constant 0 : index
    %c0_4 = arith.constant 0 : index
    %4 = vector.load %arg5[%c0_3, %c0_4] : memref<4x1xi32, #tpu.memory_space<vmem>>, vector<4x1xi32>
    %c0_5 = arith.constant 0 : index
    %c0_6 = arith.constant 0 : index
    %5 = vector.load %arg6[%c0_5, %c0_6] : memref<4x1xi32, #tpu.memory_space<vmem>>, vector<4x1xi32>
    %c0_7 = arith.constant 0 : index
    %c0_8 = arith.constant 0 : index
    %6 = vector.load %arg7[%c0_7, %c0_8] : memref<4x1xi32, #tpu.memory_space<vmem>>, vector<4x1xi32>
    %c0_9 = arith.constant 0 : index
    %c0_10 = arith.constant 0 : index
    %7 = vector.load %arg1[%c0_9, %c0_10] : memref<256x128xf32, #tpu.memory_space<vmem>>, vector<256x128xf32>
    %cst_11 = arith.constant dense<0.000000e+00> : vector<4x128xf32>
    %8 = tpu.matmul %3, %7, %cst_11 {dimension_numbers = #tpu.dot_dimension_numbers<[1], [0], [0], [1], [0, 0, 1, 1], [], []>} : vector<4x256xf32>, vector<256x128xf32>, vector<4x128xf32> -> vector<4x128xf32>
    %c0_12 = arith.constant 0 : index
    %c0_13 = arith.constant 0 : index
    %9 = vector.load %arg2[%c0_12, %c0_13] : memref<1x128xf32, #tpu.memory_space<vmem>>, vector<1x128xf32>
    %10 = vector.broadcast %9 : vector<1x128xf32> to vector<4x128xf32>
    %11 = arith.addf %8, %10 : vector<4x128xf32>
    %12 = tpu.iota {dimensions = array<i32: 1>} : vector<4x128xi32>
    %c8_i32 = arith.constant 8 : i32
    %13 = vector.broadcast %c8_i32 : i32 to vector<4x128xi32>
    %14 = arith.cmpi slt, %12, %13 : vector<4x128xi32>
    %cst_14 = arith.constant -1.000000e+30 : f32
    %15 = vector.broadcast %cst_14 : f32 to vector<4x128xf32>
    %16 = arith.select %14, %11, %15 : vector<4x128xi1>, vector<4x128xf32>
    %cst_15 = arith.constant dense<0xFF800000> : vector<4xf32>
    %17 = vector.multi_reduction <maximumf>, %16, %cst_15 [1] : vector<4x128xf32> to vector<4xf32>
    %18 = vector.shape_cast %17 : vector<4xf32> to vector<4x1xf32>
    %19 = vector.broadcast %18 : vector<4x1xf32> to vector<4x128xf32>
    %20 = arith.subf %11, %19 : vector<4x128xf32>
    %cst_16 = arith.constant -1.000000e+30 : f32
    %21 = vector.broadcast %cst_16 : f32 to vector<4x128xf32>
    %22 = arith.select %14, %20, %21 : vector<4x128xi1>, vector<4x128xf32>
    %23 = math.exp %22 : vector<4x128xf32>
    %cst_17 = arith.constant dense<0.000000e+00> : vector<4xf32>
    %24 = vector.multi_reduction <add>, %23, %cst_17 [1] : vector<4x128xf32> to vector<4xf32>
    %25 = vector.shape_cast %24 : vector<4xf32> to vector<4x1xf32>
    %26 = math.log %25 : vector<4x1xf32>
    %27 = arith.addf %18, %26 : vector<4x1xf32>
    %28 = vector.broadcast %4 : vector<4x1xi32> to vector<4x128xi32>
    %29 = arith.cmpi eq, %12, %28 : vector<4x128xi32>
    %cst_18 = arith.constant 0.000000e+00 : f32
    %30 = vector.broadcast %cst_18 : f32 to vector<4x128xf32>
    %31 = arith.select %29, %11, %30 : vector<4x128xi1>, vector<4x128xf32>
    %cst_19 = arith.constant dense<0.000000e+00> : vector<4xf32>
    %32 = vector.multi_reduction <add>, %31, %cst_19 [1] : vector<4x128xf32> to vector<4xf32>
    %33 = vector.shape_cast %32 : vector<4xf32> to vector<4x1xf32>
    %34 = arith.subf %27, %33 : vector<4x1xf32>
    %cst_20 = arith.constant dense<0.000000e+00> : vector<1xf32>
    %35 = vector.multi_reduction <add>, %34, %cst_20 [0] : vector<4x1xf32> to vector<1xf32>
    %36 = vector.shape_cast %35 : vector<1xf32> to vector<1x1xf32>
    %37 = vector.shape_cast %3 : vector<4x256xf32> to vector<4x1x256xf32>
    %c0_21 = arith.constant 0 : index
    %c0_22 = arith.constant 0 : index
    %c0_23 = arith.constant 0 : index
    %38 = vector.load %arg3[%c0_21, %c0_22, %c0_23] : memref<4x256x128xf32, #tpu.memory_space<vmem>>, vector<4x256x128xf32>
    "tpu.trace_start"() <{level = 10 : i32, message = "bkd,bdf->bkf"}> : () -> ()
    %cst_24 = arith.constant dense<0.000000e+00> : vector<4x1x128xf32>
    %39 = tpu.matmul %37, %38, %cst_24 {dimension_numbers = #tpu.dot_dimension_numbers<[2], [1], [1], [2], [0, 0, 0, 1, 1, 2], [0], [0]>} : vector<4x1x256xf32>, vector<4x256x128xf32>, vector<4x1x128xf32> -> vector<4x1x128xf32>
    "tpu.trace_stop"() : () -> ()
    %40 = vector.shape_cast %39 : vector<4x1x128xf32> to vector<4x128xf32>
    %c0_25 = arith.constant 0 : index
    %c0_26 = arith.constant 0 : index
    %41 = vector.load %arg4[%c0_25, %c0_26] : memref<4x128xf32, #tpu.memory_space<vmem>>, vector<4x128xf32>
    %42 = arith.addf %40, %41 : vector<4x128xf32>
    %43 = tpu.iota {dimensions = array<i32: 1>} : vector<4x128xi32>
    %44 = vector.broadcast %6 : vector<4x1xi32> to vector<4x128xi32>
    %45 = arith.cmpi slt, %43, %44 : vector<4x128xi32>
    %cst_27 = arith.constant -1.000000e+30 : f32
    %46 = vector.broadcast %cst_27 : f32 to vector<4x128xf32>
    %47 = arith.select %45, %42, %46 : vector<4x128xi1>, vector<4x128xf32>
    %cst_28 = arith.constant dense<0xFF800000> : vector<4xf32>
    %48 = vector.multi_reduction <maximumf>, %47, %cst_28 [1] : vector<4x128xf32> to vector<4xf32>
    %49 = vector.shape_cast %48 : vector<4xf32> to vector<4x1xf32>
    %50 = vector.broadcast %49 : vector<4x1xf32> to vector<4x128xf32>
    %51 = arith.subf %42, %50 : vector<4x128xf32>
    %cst_29 = arith.constant -1.000000e+30 : f32
    %52 = vector.broadcast %cst_29 : f32 to vector<4x128xf32>
    %53 = arith.select %45, %51, %52 : vector<4x128xi1>, vector<4x128xf32>
    %54 = math.exp %53 : vector<4x128xf32>
    %cst_30 = arith.constant dense<0.000000e+00> : vector<4xf32>
    %55 = vector.multi_reduction <add>, %54, %cst_30 [1] : vector<4x128xf32> to vector<4xf32>
    %56 = vector.shape_cast %55 : vector<4xf32> to vector<4x1xf32>
    %57 = math.log %56 : vector<4x1xf32>
    %58 = arith.addf %49, %57 : vector<4x1xf32>
    %59 = vector.broadcast %5 : vector<4x1xi32> to vector<4x128xi32>
    %60 = arith.cmpi eq, %43, %59 : vector<4x128xi32>
    %cst_31 = arith.constant 0.000000e+00 : f32
    %61 = vector.broadcast %cst_31 : f32 to vector<4x128xf32>
    %62 = arith.select %60, %42, %61 : vector<4x128xi1>, vector<4x128xf32>
    %cst_32 = arith.constant dense<0.000000e+00> : vector<4xf32>
    %63 = vector.multi_reduction <add>, %62, %cst_32 [1] : vector<4x128xf32> to vector<4xf32>
    %64 = vector.shape_cast %63 : vector<4xf32> to vector<4x1xf32>
    %65 = arith.subf %58, %64 : vector<4x1xf32>
    %c1_i32 = arith.constant 1 : i32
    %66 = vector.broadcast %c1_i32 : i32 to vector<4x1xi32>
    %67 = arith.cmpi sgt, %6, %66 : vector<4x1xi32>
    %68 = arith.extui %67 : vector<4x1xi1> to vector<4x1xi32>
    %69 = arith.sitofp %68 : vector<4x1xi32> to vector<4x1xf32>
    %70 = arith.mulf %69, %65 : vector<4x1xf32>
    %cst_33 = arith.constant dense<0.000000e+00> : vector<1xf32>
    %71 = vector.multi_reduction <add>, %70, %cst_33 [0] : vector<4x1xf32> to vector<1xf32>
    %72 = vector.shape_cast %71 : vector<1xf32> to vector<1x1xf32>
    %cst_34 = arith.constant dense<0.000000e+00> : vector<1xf32>
    %73 = vector.multi_reduction <add>, %69, %cst_34 [0] : vector<4x1xf32> to vector<1xf32>
    %74 = vector.shape_cast %73 : vector<1xf32> to vector<1x1xf32>
    %75 = arith.addf %36, %72 : vector<1x1xf32>
    %cst_35 = arith.constant 4.000000e+00 : f32
    %76 = vector.broadcast %cst_35 : f32 to vector<1x1xf32>
    %77 = arith.addf %76, %74 : vector<1x1xf32>
    %78 = arith.divf %75, %77 : vector<1x1xf32>
    %c0_36 = arith.constant 0 : index
    %c0_37 = arith.constant 0 : index
    %79 = vector.load %arg8[%c0_36, %c0_37] : memref<1x1xf32, #tpu.memory_space<vmem>>, vector<1x1xf32>
    tpu.vector_store %arg8[%c0_36, %c0_37], %78 {strides = array<i32>} : memref<1x1xf32, #tpu.memory_space<vmem>>, vector<1x1xf32>,
    return
  }
}

</mosaic_0001>

<bundles_post_ra>
// kernel: net_supervised_loss_forward.1
= control target key start
LH: loop header
LB: loop body
LE: loop exit
PB: predicated region body
PF: predicated region fallthrough
CT: control target
= control target key end

     0   :  { %v695_v4 = vmov 8.0   ;;  %vm148_vm1 = vcmask 1041409   ;;  %vm150_vm2 = vcmask 1042434   ;;  %vm152_vm3 = vcmask 1043459   ;;  %s1356_s0 = inlined_call_operand.vmem [shape: f32[4,8,256], index: 0, kind: input, shape index: {}]   ;;  %s1357_s1 = inlined_call_operand.vmem [shape: f32[256,128], index: 1, kind: input, shape index: {}]   ;;  %s1358_s2 = inlined_call_operand.vmem [shape: f32[1,128], index: 2, kind: input, shape index: {}]   ;;  %s1359_s3 = inlined_call_operand.vmem [shape: f32[4,256,128], index: 3, kind: input, shape index: {}]   ;;  %s1360_s4 = inlined_call_operand.vmem [shape: f32[4,128], index: 4, kind: input, shape index: {}]   ;;  %s1361_s5 = inlined_call_operand.vmem [shape: s32[4,1], index: 5, kind: input, shape index: {}]   ;;  %s1362_s6 = inlined_call_operand.vmem [shape: s32[4,1], index: 6, kind: input, shape index: {}]   ;;  %s1363_s7 = inlined_call_operand.vmem [shape: s32[4,1], index: 7, kind: input, shape index: {}]   ;;  %s1364_s8 = inlined_call_operand.hbm [shape: f32[1,1], index: 8, kind: output, shape index: {}]  }
   0x1   :  { %v119_v0 = vld [vmem:[%s1357_s1 + $0x78] sm:$0xff]  ;;  %v118_v2 = vld [vmem:[%s1357_s1 + $0x70] sm:$0xff]  ;;  %657 = vrcp.f32 %v695_v4  ;;  %v117_v5 = vld [vmem:[%s1357_s1 + $0x68] sm:$0xff] }
   0x2   :  { %v135_v1 = vld [vmem:[%s1357_s1 + $0xf8] sm:$0xff]  ;;  %159 = vmatpush.msra.mxu0 %v119_v0  ;;  %v134_v3 = vld [vmem:[%s1357_s1 + $0xf0] sm:$0xff]  ;;  %v133_v6 = vld [vmem:[%s1357_s1 + $0xe8] sm:$0xff] }
   0x3   :  { %179 = vmatpush.msra.mxu1 %v135_v1  ;;  %v116_v7 = vld [vmem:[%s1357_s1 + $0x60] sm:$0xff]  ;;  %v248_v9 = vld [vmem:[%s1359_s3 + $0x78] sm:$0xff]  ;;  %v247_v13 = vld [vmem:[%s1359_s3 + $0x70] sm:$0xff] }
   0x4   :  { %160 = vmatpush.msra.mxu0 %v118_v2  ;;  %v132_v8 = vld [vmem:[%s1357_s1 + $0xe0] sm:$0xff]  ;;  %v264_v10 = vld [vmem:[%s1359_s3 + $0xf8] sm:$0xff]  ;;  %361 = vmatpush.msra.mxu2 %v248_v9  ;;  %v114_v15 = vld [vmem:[%s1357_s1 + $0x50] sm:$0xff] }
   0x5   :  { %180 = vmatpush.msra.mxu1 %v134_v3  ;;  %v115_v11 = vld [vmem:[%s1357_s1 + $0x58] sm:$0xff]  ;;  %381 = vmatpush.msra.mxu3 %v264_v10  ;;  %v263_v16 = vld [vmem:[%s1359_s3 + $0xf0] sm:$0xff]  ;;  %v246_v18 = vld [vmem:[%s1359_s3 + $0x68] sm:$0xff] }
   0x6   :  { %161 = vmatpush.msra.mxu0 %v117_v5  ;;  %v131_v12 = vld [vmem:[%s1357_s1 + $0xd8] sm:$0xff]  ;;  %v130_v17 = vld [vmem:[%s1357_s1 + $0xd0] sm:$0xff]  ;;  %362 = vmatpush.msra.mxu2 %v247_v13  ;;  %v262_v19 = vld [vmem:[%s1359_s3 + $0xe8] sm:$0xff] }
   0x7   :  { %181 = vmatpush.msra.mxu1 %v133_v6  ;;  %v783_v14 = vpop.eup %657  ;;  %382 = vmatpush.msra.mxu3 %v263_v16  ;;  %v245_v21 = vld [vmem:[%s1359_s3 + $0x60] sm:$0xff]  ;;  %v113_v23 = vld [vmem:[%s1357_s1 + $0x48] sm:$0xff]  ;;  %v244_v26 = vld [vmem:[%s1359_s3 + $0x58] sm:$0xff] }
   0x8   :  { %162 = vmatpush.msra.mxu0 %v116_v7  ;;  %v87_v20 = vmul.f32 8.0, %v783_v14  ;;  %v261_v22 = vld [vmem:[%s1359_s3 + $0xe0] sm:$0xff]  ;;  %v129_v24 = vld [vmem:[%s1357_s1 + $0xc8] sm:$0xff]  ;;  %363 = vmatpush.msra.mxu2 %v246_v18  ;;  %v260_v27 = vld [vmem:[%s1359_s3 + $0xd8] sm:$0xff]  ;;  %vm91_vm0 = vweird.f32 %v783_v14 }
   0x9   :  { %182 = vmatpush.msra.mxu1 %v132_v8  ;;  %383 = vmatpush.msra.mxu3 %v262_v19  ;;  %v112_v28 = vld [vmem:[%s1357_s1 + $0x40] sm:$0xff]  ;;  %v243_v31 = vld [vmem:[%s1359_s3 + $0x50] sm:$0xff]  ;;  %v111_v33 = vld [vmem:[%s1357_s1 + $0x38] sm:$0xff] }
   0xa   :  { %163 = vmatpush.msra.mxu0 %v115_v11  ;;  %v88_v25 = vsub.f32 1.0, %v87_v20  ;;  %v128_v29 = vld [vmem:[%s1357_s1 + $0xc0] sm:$0xff]  ;;  %364 = vmatpush.msra.mxu2 %v245_v21  ;;  %v259_v32 = vld [vmem:[%s1359_s3 + $0xd0] sm:$0xff]  ;;  %v127_v34 = vld [vmem:[%s1357_s1 + $0xb8] sm:$0xff] }
   0xb   :  { %183 = vmatpush.msra.mxu1 %v131_v12  ;;  %384 = vmatpush.msra.mxu3 %v261_v22  ;;  %v110_v35 = vld [vmem:[%s1357_s1 + $0x30] sm:$0xff]  ;;  %v242_v38 = vld [vmem:[%s1359_s3 + $0x48] sm:$0xff]  ;;  %v30_v42 = vld [vmem:[%s1356_s0] sm:$0xff] }
   0xc   :  { %164 = vmatpush.msra.mxu0 %v114_v15  ;;  %v89_v30 = vmul.f32 %v783_v14, %v88_v25  ;;  %365 = vmatpush.msra.mxu2 %v244_v26  ;;  %v126_v37 = vld [vmem:[%s1357_s1 + $0xb0] sm:$0xff]  ;;  %v258_v39 = vld [vmem:[%s1359_s3 + $0xc8] sm:$0xff]  ;;  %v34_v44 = vld [vmem:[%s1356_s0 + $0x20] sm:$0xff]  ;;  %v38_v48 = vrot.slane %v30_v42, 4 }
   0xd   :  { %184 = vmatpush.msra.mxu1 %v130_v17  ;;  %385 = vmatpush.msra.mxu3 %v260_v27  ;;  %v109_v40 = vld [vmem:[%s1357_s1 + $0x28] sm:$0xff]  ;;  %v32_v43 = vld [vmem:[%s1356_s0 + $0x10] sm:$0xff]  ;;  %v241_v45 = vld [vmem:[%s1359_s3 + $0x40] sm:$0xff]  ;;  %v62_v50 = vrot.slane %v34_v44, 4 }
   0xe   :  { %165 = vmatpush.msra.mxu0 %v113_v23  ;;  %v90_v36 = vadd.f32 %v783_v14, %v89_v30  ;;  %v125_v41 = vld [vmem:[%s1357_s1 + $0xa8] sm:$0xff]  ;;  %366 = vmatpush.msra.mxu2 %v243_v31  ;;  %v257_v46 = vld [vmem:[%s1359_s3 + $0xc0] sm:$0xff]  ;;  %v36_v47 = vld [vmem:[%s1356_s0 + $0x30] sm:$0xff]  ;;  %v50_v49 = vrot.slane %v32_v43, 4  ;;  %v39_v56 = vadd.f32 %v38_v48, %v30_v42 }
   0xf   :  { %185 = vmatpush.msra.mxu1 %v129_v24  ;;  %386 = vmatpush.msra.mxu3 %v259_v32  ;;  %v74_v51 = vrot.slane %v36_v47, 4  ;;  %v240_v53 = vld [vmem:[%s1359_s3 + $0x38] sm:$0xff]  ;;  %v31_v55 = vld [vmem:[%s1356_s0 + $0x8] sm:$0xff]  ;;  %v63_v58 = vadd.f32 %v62_v50, %v34_v44  ;;  %v108_v63 = vld [vmem:[%s1357_s1 + $0x20] sm:$0xff] }
  0x10   :  { %166 = vmatpush.msra.mxu0 %v112_v28  ;;  %367 = vmatpush.msra.mxu2 %v242_v38  ;;  %v879_v52 = vsel %vm91_vm0, %v783_v14, %v90_v36  ;;  %v256_v54 = vld [vmem:[%s1359_s3 + $0xb8] sm:$0xff]  ;;  %v51_v57 = vadd.f32 %v50_v49, %v32_v43  ;;  %v35_v60 = vld [vmem:[%s1356_s0 + $0x28] sm:$0xff]  ;;  %v44_v62 = vrot.slane %v31_v55, 4  ;;  %v124_v0 = vld [vmem:[%s1357_s1 + $0xa0] sm:$0xff]  ;;  %v40_v5 = vrot.slane %v39_v56, 2 }
  0x11   :  { %186 = vmatpush.msra.mxu1 %v128_v29  ;;  %387 = vmatpush.msra.mxu3 %v258_v39  ;;  %v33_v59 = vld [vmem:[%s1356_s0 + $0x18] sm:$0xff]  ;;  %v75_v1 = vadd.f32 %v74_v51, %v36_v47  ;;  %v68_v3 = vrot.slane %v35_v60, 4  ;;  %v64_v7 = vrot.slane %v63_v58, 2  ;;  %v239_v9 = vld [vmem:[%s1359_s3 + $0x30] sm:$0xff]  ;;  %v238_v21 = vld [vmem:[%s1359_s3 + $0x28] sm:$0xff] }
  0x12   :  { %167 = vmatpush.msra.mxu0 %v111_v33  ;;  %v37_v61 = vld [vmem:[%s1356_s0 + $0x38] sm:$0xff]  ;;  %368 = vmatpush.msra.mxu2 %v241_v45  ;;  %v56_v2 = vrot.slane %v33_v59, 4  ;;  %v52_v6 = vrot.slane %v51_v57, 2  ;;  %v45_v8 = vadd.f32 %v44_v62, %v31_v55  ;;  %v255_v10 = vld [vmem:[%s1359_s3 + $0xb0] sm:$0xff]  ;;  %v41_v17 = vadd.f32 %v40_v5, %v39_v56  ;;  %v254_v22 = vld [vmem:[%s1359_s3 + $0xa8] sm:$0xff] }
  0x13   :  { %187 = vmatpush.msra.mxu1 %v127_v34  ;;  %388 = vmatpush.msra.mxu3 %v257_v46  ;;  %v80_v4 = vrot.slane %v37_v61, 4  ;;  %v107_v11 = vld [vmem:[%s1357_s1 + $0x18] sm:$0xff]  ;;  %v76_v13 = vrot.slane %v75_v1, 2  ;;  %v69_v15 = vadd.f32 %v68_v3, %v35_v60  ;;  %v65_v19 = vadd.f32 %v64_v7, %v63_v58  ;;  %v106_v23 = vld [vmem:[%s1357_s1 + $0x10] sm:$0xff]  ;;  %v237_v33 = vld [vmem:[%s1359_s3 + $0x20] sm:$0xff] }
  0x14   :  { %168 = vmatpush.msra.mxu0 %v110_v35  ;;  %v123_v12 = vld [vmem:[%s1357_s1 + $0x98] sm:$0xff]  ;;  %369 = vmatpush.msra.mxu2 %v240_v53  ;;  %v57_v14 = vadd.f32 %v56_v2, %v33_v59  ;;  %v53_v18 = vadd.f32 %v52_v6, %v51_v57  ;;  %v46_v20 = vrot.slane %v45_v8, 2  ;;  %v122_v24 = vld [vmem:[%s1357_s1 + $0x90] sm:$0xff]  ;;  %v42_v29 = vrot.slane %v41_v17, 1  ;;  %v253_v34 = vld [vmem:[%s1359_s3 + $0xa0] sm:$0xff] }
  0x15   :  { %188 = vmatpush.msra.mxu1 %v126_v37  ;;  %389 = vmatpush.msra.mxu3 %v256_v54  ;;  %v81_v16 = vadd.f32 %v80_v4, %v37_v61  ;;  %v77_v25 = vadd.f32 %v76_v13, %v75_v1  ;;  %v70_v27 = vrot.slane %v69_v15, 2  ;;  %v66_v31 = vrot.slane %v65_v19, 1  ;;  %v105_v35 = vld [vmem:[%s1357_s1 + $0x8] sm:$0xff]  ;;  %v236_v45 = vld [vmem:[%s1359_s3 + $0x18] sm:$0xff]  ;;  %v104_v46 = vld [vmem:[%s1357_s1] sm:$0xff] }
  0x16   :  { %169 = vmatpush.msra.mxu0 %v109_v40  ;;  %v58_v26 = vrot.slane %v57_v14, 2  ;;  %370 = vmatpush.msra.mxu2 %v239_v9  ;;  %v54_v30 = vrot.slane %v53_v18, 1  ;;  %v47_v32 = vadd.f32 %v46_v20, %v45_v8  ;;  %v121_v36 = vld [vmem:[%s1357_s1 + $0x88] sm:$0xff]  ;;  %v120_v47 = vld [vmem:[%s1357_s1 + $0x80] sm:$0xff]  ;;  %v280_v56 = vld [vmem:[%s1359_s3 + $0x178] sm:$0xff] }
  0x17   :  { %189 = vmatpush.msra.mxu1 %v125_v41  ;;  %v82_v28 = vrot.slane %v81_v16, 2  ;;  %390 = vmatpush.msra.mxu3 %v255_v10  ;;  %v78_v37 = vrot.slane %v77_v25, 1  ;;  %v71_v39 = vadd.f32 %v70_v27, %v69_v15  ;;  %v43_v41 = vadd.f32 %v42_v29, %v41_v17  ;;  %v296_v57 = vld [vmem:[%s1359_s3 + $0x1f8] sm:$0xff]  ;;  %v295_v2 = vld [vmem:[%s1359_s3 + $0x1f0] sm:$0xff]  ;;  %v293_v15 = vld [vmem:[%s1359_s3 + $0x1e0] sm:$0xff] }
  0x18   :  { %170 = vmatpush.msra.mxu0 %v108_v63  ;;  %v59_v38 = vadd.f32 %v58_v26, %v57_v14  ;;  %371 = vmatpush.msra.mxu2 %v238_v21  ;;  %v55_v42 = vadd.f32 %v54_v30, %v53_v18  ;;  %v67_v43 = vadd.f32 %v66_v31, %v65_v19  ;;  %v48_v44 = vrot.slane %v47_v32, 1  ;;  %v252_v62 = vld [vmem:[%s1359_s3 + $0x98] sm:$0xff]  ;;  %v235_v63 = vld [vmem:[%s1359_s3 + $0x10] sm:$0xff]  ;;  %v277_v18 = vld [vmem:[%s1359_s3 + $0x160] sm:$0xff] }
  0x19   :  { %190 = vmatpush.msra.mxu1 %v124_v0  ;;  %v83_v40 = vadd.f32 %v82_v28, %v81_v16  ;;  %391 = vmatpush.msra.mxu3 %v254_v22  ;;  %v79_v48 = vadd.f32 %v78_v37, %v77_v25  ;;  %v72_v50 = vrot.slane %v71_v39, 1  ;;  %v951_v53 = vmul.f32 %v879_v52, %v43_v41  ;;  %v279_v6 = vld [vmem:[%s1359_s3 + $0x170] sm:$0xff]  ;;  %v250_v16 = vld [vmem:[%s1359_s3 + $0x88] sm:$0xff]  ;;  %v233_v19 = vld [vmem:[%s1359_s3] sm:$0xff] }
  0x1a   :  { %171 = vmatpush.msra.mxu0 %v107_v11  ;;  %v60_v49 = vrot.slane %v59_v38, 1  ;;  %372 = vmatpush.msra.mxu2 %v237_v33  ;;  %v954_v54 = vmul.f32 %v879_v52, %v55_v42  ;;  %v957_v55 = vmul.f32 %v879_v52, %v67_v43  ;;  %v49_v59 = vadd.f32 %v48_v44, %v47_v32  ;;  %v251_v7 = vld [vmem:[%s1359_s3 + $0x90] sm:$0xff]  ;;  %v294_v11 = vld [vmem:[%s1359_s3 + $0x1e8] sm:$0xff]  ;;  %v292_v20 = vld [vmem:[%s1359_s3 + $0x1d8] sm:$0xff] }
  0x1b   :  { %191 = vmatpush.msra.mxu1 %v123_v12  ;;  %v84_v51 = vrot.slane %v83_v40, 1  ;;  %392 = vmatpush.msra.mxu3 %v253_v34  ;;  %v966_v58 = vmul.f32 %v879_v52, %v79_v48  ;;  %v73_v61 = vadd.f32 %v72_v50, %v71_v39  ;;  %v234_v12 = vld [vmem:[%s1359_s3 + $0x8] sm:$0xff]  ;;  %v249_v21 = vld [vmem:[%s1359_s3 + $0x80] sm:$0xff]  ;;  %v276_v22 = vld [vmem:[%s1359_s3 + $0x158] sm:$0xff] }
  0x1c   :  { %172 = vmatpush.msra.mxu0 %v106_v23  ;;  %v61_v60 = vadd.f32 %v60_v49, %v59_v38  ;;  %373 = vmatpush.msra.mxu2 %v236_v45  ;;  %v149_v0 = vsel %vm148_vm1, %v954_v54, %v951_v53  ;;  %v983_v4 = vmul.f32 %v879_v52, %v49_v59  ;;  %v312_v23 = vld [vmem:[%s1359_s3 + $0x278] sm:$0xff]  ;;  %v275_v26 = vld [vmem:[%s1359_s3 + $0x150] sm:$0xff]  ;;  %v290_v28 = vld [vmem:[%s1359_s3 + $0x1c8] sm:$0xff] }
  0x1d   :  { %192 = vmatpush.msra.mxu1 %v122_v24  ;;  %v85_v1 = vadd.f32 %v84_v51, %v83_v40  ;;  %v151_v3 = vsel %vm150_vm2, %v957_v55, %v149_v0  ;;  %v997_v9 = vmul.f32 %v879_v52, %v73_v61  ;;  %393 = vmatpush.msra.mxu3 %v252_v62  ;;  %v291_v24 = vld [vmem:[%s1359_s3 + $0x1d0] sm:$0xff]  ;;  %v328_v25 = vld [vmem:[%s1359_s3 + $0x2f8] sm:$0xff]  ;;  %v274_v30 = vld [vmem:[%s1359_s3 + $0x148] sm:$0xff] }
  0x1e   :  { %173 = vmatpush.msra.mxu0 %v105_v35  ;;  %v986_v5 = vmul.f32 %v879_v52, %v61_v60  ;;  %v153_v8 = vsel %vm152_vm3, %v966_v58, %v151_v3  ;;  %374 = vmatpush.msra.mxu2 %v235_v63  ;;  %v311_v27 = vld [vmem:[%s1359_s3 + $0x270] sm:$0xff]  ;;  %v310_v31 = vld [vmem:[%s1359_s3 + $0x268] sm:$0xff]  ;;  %v289_v32 = vld [vmem:[%s1359_s3 + $0x1c0] sm:$0xff] }
  0x1f   :  { %193 = vmatpush.msra.mxu1 %v121_v36  ;;  %v1000_v10 = vmul.f32 %v879_v52, %v85_v1  ;;  %v278_v52 = vld [vmem:[%s1359_s3 + $0x168] sm:$0xff]  ;;  %394 = vmatpush.msra.mxu3 %v251_v7  ;;  %v327_v29 = vld [vmem:[%s1359_s3 + $0x2f0] sm:$0xff]  ;;  %v273_v34 = vld [vmem:[%s1359_s3 + $0x140] sm:$0xff] }
  0x20   :  { %174 = vmatpush.msra.mxu0 %v104_v46  ;;  %v154_v13 = vsel %vm148_vm1, %v986_v5, %v983_v4  ;;  %375 = vmatpush.msra.mxu2 %v234_v12  ;;  %v326_v33 = vld [vmem:[%s1359_s3 + $0x2e8] sm:$0xff]  ;;  %v309_v35 = vld [vmem:[%s1359_s3 + $0x260] sm:$0xff]  ;;  %v288_v36 = vld [vmem:[%s1359_s3 + $0x1b8] sm:$0xff] }
  0x21   :  { %194 = vmatpush.msra.mxu1 %v120_v47  ;;  %175 = vmatmul.f32.vlgmr.msra.gmra.mxu0 %v153_v8  ;;  %v155_v14 = vsel %vm150_vm2, %v997_v9, %v154_v13  ;;  %v325_v37 = vld [vmem:[%s1359_s3 + $0x2e0] sm:$0xff]  ;;  %v272_v38 = vld [vmem:[%s1359_s3 + $0x138] sm:$0xff]  ;;  %v287_v40 = vld [vmem:[%s1359_s3 + $0x1b0] sm:$0xff] }
  0x22   :  { %401 = vmatpush.msrb.mxu0 %v280_v56  ;;  %v156_v17 = vsel %vm152_vm3, %v1000_v10, %v155_v14  ;;  %395 = vmatpush.msra.mxu3 %v250_v16  ;;  %v308_v39 = vld [vmem:[%s1359_s3 + $0x258] sm:$0xff]  ;;  %v271_v42 = vld [vmem:[%s1359_s3 + $0x130] sm:$0xff]  ;;  %v286_v44 = vld [vmem:[%s1359_s3 + $0x1a8] sm:$0xff] }
  0x23   :  { %421 = vmatpush.msrb.mxu1 %v296_v57  ;;  %376 = vmatpush.msra.mxu2 %v233_v19  ;;  %v324_v41 = vld [vmem:[%s1359_s3 + $0x2d8] sm:$0xff]  ;;  %v307_v43 = vld [vmem:[%s1359_s3 + $0x250] sm:$0xff]  ;;  %v270_v46 = vld [vmem:[%s1359_s3 + $0x128] sm:$0xff] }
  0x24   :  { %402 = vmatpush.msrb.mxu0 %v279_v6  ;;  %195 = vmatmul.f32.vlgmr.msra.gmra.mxu1 %v156_v17  ;;  %v323_v45 = vld [vmem:[%s1359_s3 + $0x2d0] sm:$0xff]  ;;  %v306_v47 = vld [vmem:[%s1359_s3 + $0x248] sm:$0xff]  ;;  %v285_v48 = vld [vmem:[%s1359_s3 + $0x1a0] sm:$0xff] }
  0x25   :  { %422 = vmatpush.msrb.mxu1 %v295_v2  ;;  %396 = vmatpush.msra.mxu3 %v249_v21  ;;  %v322_v49 = vld [vmem:[%s1359_s3 + $0x2c8] sm:$0xff]  ;;  %v269_v50 = vld [vmem:[%s1359_s3 + $0x120] sm:$0xff]  ;;  %v284_v51 = vld [vmem:[%s1359_s3 + $0x198] sm:$0xff] }
  0x26   :  { %403 = vmatpush.msrb.mxu0 %v278_v52  ;;  %441 = vmatpush.msrb.mxu2 %v312_v23  ;;  %v305_v56 = vld [vmem:[%s1359_s3 + $0x240] sm:$0xff] }
  0x27   :  { %423 = vmatpush.msrb.mxu1 %v294_v11  ;;  %461 = vmatpush.msrb.mxu3 %v328_v25  ;;  %v321_v57 = vld [vmem:[%s1359_s3 + $0x2c0] sm:$0xff] }
  0x28   :  { %404 = vmatpush.msrb.mxu0 %v277_v18  ;;  %442 = vmatpush.msrb.mxu2 %v311_v27 }
  0x29   :  { %424 = vmatpush.msrb.mxu1 %v293_v15  ;;  %462 = vmatpush.msrb.mxu3 %v327_v29 }
  0x2a   :  { %405 = vmatpush.msrb.mxu0 %v276_v22  ;;  %443 = vmatpush.msrb.mxu2 %v310_v31 }
  0x2b   :  { %425 = vmatpush.msrb.mxu1 %v292_v20  ;;  %463 = vmatpush.msrb.mxu3 %v326_v33 }
  0x2c   :  { %406 = vmatpush.msrb.mxu0 %v275_v26  ;;  %444 = vmatpush.msrb.mxu2 %v309_v35 }
  0x2d   :  { %426 = vmatpush.msrb.mxu1 %v291_v24  ;;  %464 = vmatpush.msrb.mxu3 %v325_v37 }
  0x2e   :  { %407 = vmatpush.msrb.mxu0 %v274_v30  ;;  %445 = vmatpush.msrb.mxu2 %v308_v39 }
  0x2f   :  { %427 = vmatpush.msrb.mxu1 %v290_v28  ;;  %465 = vmatpush.msrb.mxu3 %v324_v41 }
  0x30   :  { %408 = vmatpush.msrb.mxu0 %v273_v34  ;;  %446 = vmatpush.msrb.mxu2 %v307_v43 }
  0x31   :  { %428 = vmatpush.msrb.mxu1 %v289_v32  ;;  %466 = vmatpush.msrb.mxu3 %v323_v45 }
  0x32   :  { %409 = vmatpush.msrb.mxu0 %v272_v38  ;;  %447 = vmatpush.msrb.mxu2 %v306_v47 }
  0x33   :  { %429 = vmatpush.msrb.mxu1 %v288_v36 }
  0x34   :  { %410 = vmatpush.msrb.mxu0 %v271_v42 }
  0x35   :  { %430 = vmatpush.msrb.mxu1 %v287_v40 }
  0x36   :  { %411 = vmatpush.msrb.mxu0 %v270_v46 }
  0x37   :  { %431 = vmatpush.msrb.mxu1 %v286_v44 }
  0x38   :  { %13 = vsyncpa [#allocation3], 0  ;;  %v268_v59 = vld [vmem:[%s1359_s3 + $0x118] sm:$0xff]  ;;  %467 = vmatpush.msrb.mxu3 %v322_v49  ;;  %412 = vmatpush.msrb.mxu0 %v269_v50  ;;  %v283_v61 = vld [vmem:[%s1359_s3 + $0x190] sm:$0xff]  ;;  %v696_v39 = vmov 0   ;;  %v199_v50 = vlaneseq  ;;  %vm203_vm5 = vcmask 1043456  }
  0x39   :  { %432 = vmatpush.msrb.mxu1 %v285_v48  ;;  %v304_v60 = vld [vmem:[%s1359_s3 + $0x238] sm:$0xff]  ;;  %448 = vmatpush.msrb.mxu2 %v305_v56  ;;  %v267_v63 = vld [vmem:[%s1359_s3 + $0x110] sm:$0xff]  ;;  %v282_v1 = vld [vmem:[%s1359_s3 + $0x188] sm:$0xff]  ;;  %vm598_vm10 = vcmask 3072   ;;  %s639_s20 = sshll.u32 %s1364_s8, 4  ;;  %vm630_vm15 = vcmask 0   ;;  %s640_s20 = int_to_ptr.hbm [resolvable:$true] %s639_s20 }
  0x3a   :  { %v320_v62 = vld [vmem:[%s1359_s3 + $0x2b8] sm:$0xff]  ;;  %468 = vmatpush.msrb.mxu3 %v321_v57  ;;  %v303_v0 = vld [vmem:[%s1359_s3 + $0x230] sm:$0xff]  ;;  %413 = vmatpush.msrb.mxu0 %v268_v59  ;;  %v266_v3 = vld [vmem:[%s1359_s3 + $0x108] sm:$0xff]  ;;  %v1317_v56 = vand.u32 127, %v199_v50 }
  0x3b   :  { %433 = vmatpush.msrb.mxu1 %v284_v51  ;;  %449 = vmatpush.msrb.mxu2 %v304_v60  ;;  %v319_v2 = vld [vmem:[%s1359_s3 + $0x2b0] sm:$0xff]  ;;  %v302_v6 = vld [vmem:[%s1359_s3 + $0x228] sm:$0xff]  ;;  %v281_v7 = vld [vmem:[%s1359_s3 + $0x180] sm:$0xff] }
  0x3c   :  { %469 = vmatpush.msrb.mxu3 %v320_v62  ;;  %414 = vmatpush.msrb.mxu0 %v267_v63  ;;  %v318_v8 = vld [vmem:[%s1359_s3 + $0x2a8] sm:$0xff]  ;;  %v265_v11 = vld [vmem:[%s1359_s3 + $0x100] sm:$0xff]  ;;  %v360_v12 = vld [vmem:[%s1359_s3 + $0x3f8] sm:$0xff]  ;;  %vm201_vm4 = vcmp.lt.s32.totalorder %v1317_v56, 8 }
  0x3d   :  { %434 = vmatpush.msrb.mxu1 %v283_v61  ;;  %450 = vmatpush.msrb.mxu2 %v303_v0  ;;  %v344_v13 = vld [vmem:[%s1359_s3 + $0x378] sm:$0xff]  ;;  %v301_v52 = vld [vmem:[%s1359_s3 + $0x220] sm:$0xff]  ;;  %v359_v14 = vld [vmem:[%s1359_s3 + $0x3f0] sm:$0xff] }
  0x3e   :  { %470 = vmatpush.msrb.mxu3 %v319_v2  ;;  %415 = vmatpush.msrb.mxu0 %v266_v3  ;;  %v317_v15 = vld [vmem:[%s1359_s3 + $0x2a0] sm:$0xff]  ;;  %v343_v16 = vld [vmem:[%s1359_s3 + $0x370] sm:$0xff]  ;;  %v358_v17 = vld [vmem:[%s1359_s3 + $0x3e8] sm:$0xff] }
  0x3f   :  { %435 = vmatpush.msrb.mxu1 %v282_v1  ;;  %451 = vmatpush.msrb.mxu2 %v302_v6  ;;  %v342_v18 = vld [vmem:[%s1359_s3 + $0x368] sm:$0xff]  ;;  %v300_v19 = vld [vmem:[%s1359_s3 + $0x218] sm:$0xff]  ;;  %v357_v20 = vld [vmem:[%s1359_s3 + $0x3e0] sm:$0xff] }
  0x40   :  { %471 = vmatpush.msrb.mxu3 %v318_v8  ;;  %416 = vmatpush.msrb.mxu0 %v265_v11  ;;  %v316_v21 = vld [vmem:[%s1359_s3 + $0x298] sm:$0xff]  ;;  %v341_v22 = vld [vmem:[%s1359_s3 + $0x360] sm:$0xff]  ;;  %v299_v23 = vld [vmem:[%s1359_s3 + $0x210] sm:$0xff] }
  0x41   :  { %436 = vmatpush.msrb.mxu1 %v281_v7  ;;  %452 = vmatpush.msrb.mxu2 %v301_v52  ;;  %v315_v24 = vld [vmem:[%s1359_s3 + $0x290] sm:$0xff]  ;;  %v298_v25 = vld [vmem:[%s1359_s3 + $0x208] sm:$0xff]  ;;  %v297_v29 = vld [vmem:[%s1359_s3 + $0x200] sm:$0xff] }
  0x42   :  { %481 = vmatpush.msra.mxu0 %v344_v13  ;;  %472 = vmatpush.msrb.mxu3 %v317_v15  ;;  %v355_v26 = vld [vmem:[%s1359_s3 + $0x3d0] sm:$0xff]  ;;  %v314_v27 = vld [vmem:[%s1359_s3 + $0x288] sm:$0xff]  ;;  %v313_v31 = vld [vmem:[%s1359_s3 + $0x280] sm:$0xff] }
  0x43   :  { %501 = vmatpush.msra.mxu1 %v360_v12  ;;  %377 = vmatmul.f32.vlgmr.msra.gmra.mxu2 %v951_v53  ;;  %v356_v53 = vld [vmem:[%s1359_s3 + $0x3d8] sm:$0xff]  ;;  %v339_v28 = vld [vmem:[%s1359_s3 + $0x350] sm:$0xff]  ;;  %v354_v30 = vld [vmem:[%s1359_s3 + $0x3c8] sm:$0xff] }
  0x44   :  { %482 = vmatpush.msra.mxu0 %v343_v16  ;;  %397 = vmatmul.f32.vlgmr.msra.gmra.mxu3 %v983_v4  ;;  %v340_v4 = vld [vmem:[%s1359_s3 + $0x358] sm:$0xff]  ;;  %v338_v32 = vld [vmem:[%s1359_s3 + $0x348] sm:$0xff]  ;;  %v353_v33 = vld [vmem:[%s1359_s3 + $0x3c0] sm:$0xff] }
  0x45   :  { %502 = vmatpush.msra.mxu1 %v359_v14  ;;  %453 = vmatpush.msrb.mxu2 %v300_v19  ;;  %v337_v34 = vld [vmem:[%s1359_s3 + $0x340] sm:$0xff]  ;;  %v352_v35 = vld [vmem:[%s1359_s3 + $0x3b8] sm:$0xff]  ;;  %v351_v37 = vld [vmem:[%s1359_s3 + $0x3b0] sm:$0xff] }
  0x46   :  { %483 = vmatpush.msra.mxu0 %v342_v18  ;;  %473 = vmatpush.msrb.mxu3 %v316_v21  ;;  %v336_v36 = vld [vmem:[%s1359_s3 + $0x338] sm:$0xff]  ;;  %v350_v38 = vld [vmem:[%s1359_s3 + $0x3a8] sm:$0xff]  ;;  %v333_v41 = vld [vmem:[%s1359_s3 + $0x320] sm:$0xff] }
  0x47   :  { %503 = vmatpush.msra.mxu1 %v358_v17  ;;  %454 = vmatpush.msrb.mxu2 %v299_v23  ;;  %v334_v40 = vld [vmem:[%s1359_s3 + $0x328] sm:$0xff]  ;;  %v348_v42 = vld [vmem:[%s1359_s3 + $0x398] sm:$0xff]  ;;  %v347_v44 = vld [vmem:[%s1359_s3 + $0x390] sm:$0xff] }
  0x48   :  { %484 = vmatpush.msra.mxu0 %v341_v22  ;;  %474 = vmatpush.msrb.mxu3 %v315_v24  ;;  %v332_v43 = vld [vmem:[%s1359_s3 + $0x318] sm:$0xff]  ;;  %v331_v45 = vld [vmem:[%s1359_s3 + $0x310] sm:$0xff]  ;;  %v346_v46 = vld [vmem:[%s1359_s3 + $0x388] sm:$0xff] }
  0x49   :  { %504 = vmatpush.msra.mxu1 %v357_v20  ;;  %455 = vmatpush.msrb.mxu2 %v298_v25  ;;  %v330_v47 = vld [vmem:[%s1359_s3 + $0x308] sm:$0xff]  ;;  %v345_v48 = vld [vmem:[%s1359_s3 + $0x380] sm:$0xff] }
  0x4a   :  { %485 = vmatpush.msra.mxu0 %v340_v4  ;;  %475 = vmatpush.msrb.mxu3 %v314_v27  ;;  %v329_v49 = vld [vmem:[%s1359_s3 + $0x300] sm:$0xff] }
  0x4b   :  { %505 = vmatpush.msra.mxu1 %v356_v53  ;;  %456 = vmatpush.msrb.mxu2 %v297_v29  ;;  %v656_v51 = vld [vmem:[%s1358_s2] ss:$0 sm:$0xff] }
  0x4c   :  { %486 = vmatpush.msra.mxu0 %v339_v28  ;;  %476 = vmatpush.msrb.mxu3 %v313_v31  ;;  %v521_v1 = vld [vmem:[%s1360_s4] sm:$0xf]  ;;  %s698_s4 = smov [#allocation2]  }
  0x4d   :  { %506 = vmatpush.msra.mxu1 %v355_v26  ;;  %457 = vmatmul.f32.vlgmr.msrb.gmra.mxu2 %v957_v55  ;;  %v101_v55 = vld [vmem:[%s1361_s5] sm:$0xf]  ;;  %v523_v7 = vrot.slane %v521_v1, 1  ;;  %v524_v13 = vrot.slane %v521_v1, 2  ;;  %v525_v19 = vrot.slane %v521_v1, 3 }
  0x4e   :  { %487 = vmatpush.msra.mxu0 %v338_v32  ;;  %477 = vmatmul.f32.vlgmr.msrb.gmra.mxu3 %v997_v9  ;;  %v335_v9 = vld [vmem:[%s1359_s3 + $0x330] sm:$0xff] }
  0x4f   :  { %507 = vmatpush.msra.mxu1 %v354_v30  ;;  %417 = vmatmul.f32.vlgmr.msrb.gmra.mxu0 %v954_v54  ;;  %v349_v54 = vld [vmem:[%s1359_s3 + $0x3a0] sm:$0xff] }
  0x50   :  { %488 = vmatpush.msra.mxu0 %v337_v34  ;;  %437 = vmatmul.f32.vlgmr.msrb.gmra.mxu1 %v986_v5  ;;  %v1276_v5 = vld [vmem:[%s1363_s7] sm:$0xf] }
  0x51   :  { %508 = vmatpush.msra.mxu1 %v353_v33  ;;  %655 = vset.pattern.permute.xlu2 %v696_v39  ;;  %vm594_vm9 = vcmp.gt.s32.totalorder %v1276_v5, 1 }
  0x52   :  { %489 = vmatpush.msra.mxu0 %v336_v36  ;;  %218 = vperm.xlu2 %655, %v101_v55  }
  0x53   :  { %509 = vmatpush.msra.mxu1 %v352_v35  ;;  %653 = vset.pattern.permute.xlu0 %v696_v39 }
  0x54   :  { %490 = vmatpush.msra.mxu0 %v335_v9  ;;  %535 = vperm.xlu0 %653, %v1276_v5  }
  0x55   :  { %510 = vmatpush.msra.mxu1 %v351_v37  ;;  %654 = vset.pattern.permute.xlu1 %v696_v39 }
  0x56   :  { %491 = vmatpush.msra.mxu0 %v334_v40 }
  0x57   :  { %511 = vmatpush.msra.mxu1 %v350_v38 }
  0x58   :  { %492 = vmatpush.msra.mxu0 %v333_v41 }
  0x59   :  { %512 = vmatpush.msra.mxu1 %v349_v54 }
  0x5a   :  { %493 = vmatpush.msra.mxu0 %v332_v43 }
  0x5b   :  { %513 = vmatpush.msra.mxu1 %v348_v42 }
  0x5c   :  { %494 = vmatpush.msra.mxu0 %v331_v45 }
  0x5d   :  { %514 = vmatpush.msra.mxu1 %v347_v44 }
  0x5e   :  { %495 = vmatpush.msra.mxu0 %v330_v47 }
  0x5f   :  { %515 = vmatpush.msra.mxu1 %v346_v46 }
  0x60   :  { %496 = vmatpush.msra.mxu0 %v329_v49 }
  0x61   :  { %516 = vmatpush.msra.mxu1 %v345_v48  ;;  %497 = vmatmul.f32.vlgmr.msra.gmra.mxu0 %v966_v58  ;;  %v102_v58 = vld [vmem:[%s1362_s6] sm:$0xf]  ;;  %s637_s6 = sshll.u32 %s698_s4, 4  ;;  %s638_s6 = int_to_ptr.vmem [resolvable:$true] %s637_s6 }
  0x62   :  { %517 = vmatmul.f32.vlgmr.msra.gmra.mxu1 %v1000_v10 }
  0x9e   :  { %v176_v57 = vpop.f32.mrf.mxu0 }
  0x9f   :  { %v177_v59 = vadd.f32 %v656_v51, %v176_v57 }
  0xa1   :  { %v196_v60 = vpop.f32.mrf.mxu1 }
  0xa2   :  { %v197_v61 = vadd.f32 %v196_v60, %v177_v59 }
  0xa4   :  { %v202_v62 = vsel %vm201_vm4, %v197_v61, -1e+30 }
  0xa5   :  { %v204_v10 = vsel %vm203_vm5, %v202_v62, -inf  ;;  %v697_v62 = vmov 0.0  }
  0xa6   :  { %205 = vmax.xlane.f32.xlu1 %v204_v10  ;;  %v648_v10 = vsel %vm594_vm9, 1.0, %v697_v62 }
  0xac   :  { %v219_v27 = vpop.permute.xlu2 %218 }
  0xad   :  { %vm220_vm7 = vcmp.eq.s32.totalorder %v1317_v56, %v219_v27 }
  0xae   :  { %v221_v30 = vsel %vm220_vm7, %v197_v61, 0.0 }
  0xaf   :  { %v222_v31 = vsel %vm203_vm5, %v221_v30, 0.0 }
  0xbf   :  { %586 = vperm.xlu1 %654, %v102_v58   ;;  %v606_v58 = vsel %vm598_vm10, %v648_v10, 0.0 }
  0xc6   :  { %v378_v63 = vpop.f32.mrf.mxu2  ;;  %v536_v23 = vpop.permute.xlu0 %535 }
  0xc7   :  { %v398_v0 = vpop.f32.mrf.mxu3  ;;  %vm537_vm6 = vcmp.lt.s32.totalorder %v1317_v56, %v536_v23 }
  0xc8   :  { %v399_v52 = vadd.f32 %v398_v0, %v378_v63  ;;  %v607_v63 = vrot.slane %v606_v58, 4 }
  0xca   :  { %v530_v16 = vadd.f32 %v521_v1, %v399_v52  ;;  %v608_v0 = vadd.f32 %v607_v63, %v606_v58 }
  0xcc   :  { %v418_v2 = vpop.f32.mrf.mxu0  ;;  %v609_v1 = vrot.slane %v608_v0, 2 }
  0xcd   :  { %v438_v3 = vpop.f32.mrf.mxu1 }
  0xce   :  { %v439_v6 = vadd.f32 %v438_v3, %v418_v2  ;;  %v610_v3 = vadd.f32 %v609_v1, %v608_v0 }
  0xd0   :  { %v458_v8 = vpop.f32.mrf.mxu2  ;;  %v531_v14 = vadd.f32 %v523_v7, %v439_v6  ;;  %v611_v6 = vrot.slane %v610_v3, 1 }
  0xd1   :  { %v478_v11 = vpop.f32.mrf.mxu3 }
  0xd2   :  { %v479_v12 = vadd.f32 %v478_v11, %v458_v8  ;;  %v542_v17 = vrot.slane %v531_v14, 7 }
  0xd4   :  { %v532_v15 = vadd.f32 %v524_v13, %v479_v12  ;;  %v543_v24 = vsel %vm148_vm1, %v542_v17, %v530_v16 }
  0xd6   :  { %v544_v22 = vrot.slane %v532_v15, 6 }
  0xd8   :  { %v545_v25 = vsel %vm150_vm2, %v544_v22, %v543_v24 }
  0xde   :  { %v498_v20 = vpop.f32.mrf.mxu0 }
  0xdf   :  { %v518_v18 = vpop.f32.mrf.mxu1 }
  0xe0   :  { %v519_v21 = vadd.f32 %v518_v18, %v498_v20 }
  0xe2   :  { %v533_v53 = vadd.f32 %v525_v19, %v519_v21 }
  0xe4   :  { %v546_v4 = vrot.slane %v533_v53, 5 }
  0xe6   :  { %v547_v26 = vsel %vm152_vm3, %v546_v4, %v545_v25 }
  0xe7   :  { %v549_v28 = vsel %vm537_vm6, %v547_v26, -1e+30 }
  0xe8   :  { %v550_v29 = vsel %vm203_vm5, %v549_v28, -inf }
  0xe9   :  { %551 = vmax.xlane.f32.xlu0 %v550_v29 }
  0xf1   :  { %223 = vadd.xlane.f32.xlu0 %v222_v31 }
 0x119   :  { %v206_v32 = vpop.xlane.xlu1 %205 }
 0x11a   :  { %v207_v33 = vsub.f32 %v197_v61, %v206_v32 }
 0x11c   :  { %v208_v34 = vsel %vm201_vm4, %v207_v33, -1e+30 }
 0x11d   :  { %v209_v35 = vmul.f32 1.442695, %v208_v34 }
 0x11f   :  { %659 = vpow2.f32 %v209_v35 }
 0x125   :  { %v660_v36 = vpop.eup %659 }
 0x126   :  { %v211_v37 = vsel %vm203_vm5, %v660_v36, 0.0 }
 0x127   :  { %212 = vadd.xlane.f32.xlu1 %v211_v37 }
 0x131   :  { %v587_v57 = vpop.permute.xlu1 %586 }
 0x132   :  { %vm588_vm8 = vcmp.eq.s32.totalorder %v1317_v56, %v587_v57  ;;  %v612_v56 = vadd.f32 %v611_v6, %v610_v3 }
 0x133   :  { %v589_v60 = vsel %vm588_vm8, %v547_v26, 0.0 }
 0x134   :  { %v590_v61 = vsel %vm203_vm5, %v589_v60, 0.0  ;;  %v614_v11 = vadd.f32 4.0, %v612_v56 }
 0x136   :  { %vm620_vm11 = vweird.f32 %v614_v11  ;;  %v626_v30 = vand.u32 2147483648, %v614_v11  ;;  %v624_v33 = vand.u32 2147483647, %v614_v11 }
 0x138   :  { %v627_v36 = vor.u32 1.1754944e-38, %v626_v30  ;;  %vm625_vm14 = vcmp.eq.f32.partialorder %v624_v33, 8.507059e+37 }
 0x15c   :  { %v552_v55 = vpop.xlane.xlu0 %551 }
 0x15d   :  { %v554_v9 = vrot.slane %v552_v55, 1  ;;  %v555_v38 = vrot.slane %v552_v55, 2  ;;  %v556_v39 = vrot.slane %v552_v55, 3  ;;  %v561_v42 = vsub.f32 %v530_v16, %v552_v55 }
 0x15f   :  { %v562_v40 = vsub.f32 %v531_v14, %v554_v9  ;;  %v563_v54 = vsub.f32 %v532_v15, %v555_v38  ;;  %v564_v41 = vsub.f32 %v533_v53, %v556_v39 }
 0x161   :  { %v569_v43 = vrot.slane %v562_v40, 7  ;;  %v571_v44 = vrot.slane %v563_v54, 6  ;;  %v573_v46 = vrot.slane %v564_v41, 5 }
 0x163   :  { %v570_v45 = vsel %vm148_vm1, %v569_v43, %v561_v42 }
 0x164   :  { %v572_v47 = vsel %vm150_vm2, %v571_v44, %v570_v45  ;;  %v224_v13 = vpop.xlane.xlu0 %223 }
 0x165   :  { %v574_v48 = vsel %vm152_vm3, %v573_v46, %v572_v47 }
 0x166   :  { %v576_v49 = vsel %vm537_vm6, %v574_v48, -1e+30 }
 0x167   :  { %v577_v50 = vmul.f32 1.442695, %v576_v49 }
 0x169   :  { %661 = vpow2.f32 %v577_v50 }
 0x16f   :  { %v662_v51 = vpop.eup %661 }
 0x170   :  { %v579_v59 = vsel %vm203_vm5, %v662_v51, 0.0 }
 0x171   :  { %580 = vadd.xlane.f32.xlu2 %v579_v59 }
 0x179   :  { %591 = vadd.xlane.f32.xlu2 %v590_v61 }
 0x19a   :  { %v213_v2 = vpop.xlane.xlu1 %212 }
 0x19b   :  { %663 = vlog2.f32 %v213_v2 }
 0x19c   :  { %665 = vrcp.f32 %v614_v11 }
 0x1a1   :  { %v664_v7 = vpop.eup %663 }
 0x1a2   :  { %v215_v8 = vmul.f32 0.6931472, %v664_v7  ;;  %v666_v15 = vpop.eup %665 }
 0x1a3   :  { %v616_v19 = vmul.f32 %v666_v15, %v614_v11  ;;  %vm621_vm12 = vweird.f32 %v666_v15 }
 0x1a4   :  { %v216_v12 = vadd.f32 %v215_v8, %v206_v32  ;;  %vm622_vm13 = vmor %vm620_vm11, %vm621_vm12 }
 0x1a5   :  { %v617_v53 = vsub.f32 1.0, %v616_v19 }
 0x1a6   :  { %v225_v5 = vsub.f32 %v216_v12, %v224_v13 }
 0x1a7   :  { %v618_v27 = vmul.f32 %v666_v15, %v617_v53 }
 0x1a8   :  { %v226_v14 = vsel %vm203_vm5, %v225_v5, 0.0 }
 0x1a9   :  { %v227_v17 = vrot.slane %v226_v14, 4  ;;  %v619_v32 = vadd.f32 %v666_v15, %v618_v27 }
 0x1ab   :  { %v228_v21 = vadd.f32 %v227_v17, %v226_v14 }
 0x1ad   :  { %v229_v4 = vrot.slane %v228_v21, 2 }
 0x1af   :  { %v230_v28 = vadd.f32 %v229_v4, %v228_v21 }
 0x1b1   :  { %v231_v35 = vrot.slane %v230_v28, 1 }
 0x1b3   :  { %v232_v9 = vadd.f32 %v231_v35, %v230_v28 }
 0x1e4   :  { %v581_v52 = vpop.xlane.xlu2 %580 }
 0x1e5   :  { %667 = vlog2.f32 %v581_v52 }
 0x1eb   :  { %v668_v16 = vpop.eup %667 }
 0x1ec   :  { %v583_v18 = vmul.f32 0.6931472, %v668_v16  ;;  %v592_v22 = vpop.xlane.xlu2 %591 }
 0x1ee   :  { %v584_v20 = vadd.f32 %v583_v18, %v552_v55  ;;  %v623_v55 = vsel %vm622_vm13, %v666_v15, %v619_v32 }
 0x1ef   :  { %v628_v39 = vsel %vm625_vm14, %v627_v36, %v623_v55 }
 0x1f0   :  { %v593_v23 = vsub.f32 %v584_v20, %v592_v22 }
 0x1f2   :  { %v597_v24 = vmul.f32 %v648_v10, %v593_v23 }
 0x1f4   :  { %v599_v25 = vsel %vm598_vm10, %v597_v24, 0.0 }
 0x1f5   :  { %v600_v26 = vrot.slane %v599_v25, 4 }
 0x1f7   :  { %v601_v29 = vadd.f32 %v600_v26, %v599_v25 }
 0x1f9   :  { %v602_v31 = vrot.slane %v601_v29, 2 }
 0x1fb   :  { %v603_v34 = vadd.f32 %v602_v31, %v601_v29 }
 0x1fd   :  { %v604_v37 = vrot.slane %v603_v34, 1 }
 0x1ff   :  { %v605_v38 = vadd.f32 %v604_v37, %v603_v34 }
 0x201   :  { %v613_v40 = vadd.f32 %v605_v38, %v232_v9 }
 0x203   :  { %v629_v54 = vmul.f32 %v628_v39, %v613_v40 }
 0x205   :  { %631 = vst.msk [vmem:[#allocation2] sm:$0x1] %vm630_vm15, %v629_v54 }
 0x206   :  { %642 = dma.vmem_to_hbm [thread:$0]  %s638_s6, 16, %s640_s20, [#allocation3]  }
 0x207   :  { %693 = dma.done.wait [#allocation3], 16  }
 0x208   :  { %694 = vsyncadd [#allocation3], 4294967280 }
 0x209   :  { %647 = vsyncpa [#allocation3], 1 }

</bundles_post_ra>
